<compile_context>
chip_gen: v7x
topology: tpu7x:2x2x1
jax: 0.10.0
libtpu: 0.0.40
codegen_flags: <defaults>
</compile_context>

<pallas_src>
import functools

import jax
import jax.numpy as jnp
from jax.experimental import pallas as pl
from jax.experimental.pallas import tpu as pltpu

BN_EPS = 1e-5

# Batch-tile target: keeps double-buffered x/out tiles + in-kernel activation
# temporaries well under v7x's 64 MiB VMEM; on v5e/v6e (128 MiB) this could be
# raised to 2048-4096.
DEFAULT_BATCH_TILE = 1024
VMEM_LIMIT_BYTES = 32 * 1024 * 1024  # safe headroom on every generation


# ----------------------------- kernel bodies ------------------------------ #

def _linear_relu(h, w_ref, b_ref):
    """relu(h @ W + b); W is stored MXU-native (in, out), f32 accumulation."""
    z = jnp.dot(h.astype(w_ref.dtype), w_ref[...],
                preferred_element_type=jnp.float32) + b_ref[...]
    return jnp.maximum(z, 0.0)


def _accum_stats(z, stats_ref):
    """Accumulate per-column [sum; sum-of-squares] across batch tiles."""
    @pl.when(pl.program_id(0) == 0)
    def _():
        stats_ref[...] = jnp.zeros_like(stats_ref)
    stats_ref[0:1, :] += jnp.sum(z, axis=0, keepdims=True)
    stats_ref[1:2, :] += jnp.sum(z * z, axis=0, keepdims=True)


def _stats_l1_kernel(x_ref, w1_ref, b1_ref, s1_ref):
    _accum_stats(_linear_relu(x_ref[...], w1_ref, b1_ref), s1_ref)


def _stats_l2_kernel(x_ref, w1_ref, b1_ref, a1_ref, w2_ref, b2_ref, s2_ref):
    z1 = _linear_relu(x_ref[...], w1_ref, b1_ref)
    h1 = z1 * a1_ref[0:1, :] + a1_ref[1:2, :]          # fused BN1 affine
    _accum_stats(_linear_relu(h1, w2_ref, b2_ref), s2_ref)


def _output_kernel(x_ref, w1_ref, b1_ref, a1_ref, w2_ref, b2_ref, a2_ref,
                   wo_ref, bo_ref, o_ref):
    z1 = _linear_relu(x_ref[...], w1_ref, b1_ref)
    h1 = z1 * a1_ref[0:1, :] + a1_ref[1:2, :]          # fused BN1 affine
    z2 = _linear_relu(h1, w2_ref, b2_ref)
    h2 = z2 * a2_ref[0:1, :] + a2_ref[1:2, :]          # fused BN2 affine
    out = jnp.dot(h2.astype(wo_ref.dtype), wo_ref[...],
                  preferred_element_type=jnp.float32) + bo_ref[...]
    o_ref[...] = out.astype(o_ref.dtype)               # (TB, out_features)


# ------------------------------ host wrapper ------------------------------ #

def prepare_params(params, mxu_dtype=jnp.float32):
    """One-time layout plumbing (call once, outside the hot path).

    Weights are transposed to the MXU-native (in, out) layout and cast to
    mxu_dtype.  Use jnp.bfloat16 on v5e (its MXU has no native f32 path, so an
    f32 feed costs 3x+ MXU passes); bf16 is also ~2x faster on v6e/v7x with a
    small accuracy change.  Biases / BN affine params stay f32.
    """
    return {
        "w1": params["w1"].T.astype(mxu_dtype),
        "b1": params["b1"],
        "g1": params["g1"],
        "be1": params["be1"],
        "w2": params["w2"].T.astype(mxu_dtype),
        "b2": params["b2"],
        "g2": params["g2"],
        "be2": params["be2"],
        "wo": params["wo"].T.astype(mxu_dtype),
        "bo": params["bo"],
    }


def _pick_batch_tile(batch, target):
    if batch <= target:
        return batch
    t = (target // 8) * 8
    while t >= 8:
        if batch % t == 0:
            return t
        t -= 8
    # TODO(synk): pad+mask path for ragged batches; whole-batch fallback keeps
    # the math exact at the cost of VMEM residency.
    return batch


def _finalize_affine(stats, gamma, beta, batch):
    """Fold batch stats + BN affine into a single (scale, shift) pair."""
    mean = stats[0:1, :] / batch
    var = jnp.maximum(stats[1:2, :] / batch - mean * mean, 0.0)
    scale = jax.lax.rsqrt(var + BN_EPS) * gamma
    shift = beta - mean * scale
    return jnp.concatenate([scale, shift], axis=0)      # (2, n)


@functools.partial(jax.jit, static_argnames=("batch_tile",))
def mlp_vanilla_forward(x, prepared, batch_tile=None):
    """x: (B, in_features) f32.  prepared: output of prepare_params()."""
    B, in_features = x.shape
    n1 = prepared["w1"].shape[1]
    n2 = prepared["w2"].shape[1]
    n_out = prepared["wo"].shape[1]

    tb = _pick_batch_tile(B, batch_tile if batch_tile else DEFAULT_BATCH_TILE)
    nb = B // tb

    x_spec = pl.BlockSpec((tb, in_features), lambda i: (i, 0))

    def full(arr):  # whole (small) parameter, fetched once (constant index map)
        return pl.BlockSpec(arr.shape, lambda i: (0, 0))

    seq = pltpu.CompilerParams(dimension_semantics=("arbitrary",),
                               vmem_limit_bytes=VMEM_LIMIT_BYTES)
    par = pltpu.CompilerParams(dimension_semantics=("parallel",),
                               vmem_limit_bytes=VMEM_LIMIT_BYTES)

    # Pass 1: full-batch sum / sumsq of z1 = relu(x @ W1 + b1).
    s1 = pl.pallas_call(
        _stats_l1_kernel,
        out_shape=jax.ShapeDtypeStruct((2, n1), jnp.float32),
        grid_spec=pltpu.PrefetchScalarGridSpec(
            num_scalar_prefetch=0, grid=(nb,),
            in_specs=[x_spec, full(prepared["w1"]), full(prepared["b1"])],
            out_specs=pl.BlockSpec((2, n1), lambda i: (0, 0))),
        compiler_params=seq,
    )(x, prepared["w1"], prepared["b1"])
    a1 = _finalize_affine(s1, prepared["g1"], prepared["be1"], B)

    # Pass 2: full-batch sum / sumsq of z2 = relu(BN1(z1) @ W2 + b2).
    s2 = pl.pallas_call(
        _stats_l2_kernel,
        out_shape=jax.ShapeDtypeStruct((2, n2), jnp.float32),
        grid_spec=pltpu.PrefetchScalarGridSpec(
            num_scalar_prefetch=0, grid=(nb,),
            in_specs=[x_spec, full(prepared["w1"]), full(prepared["b1"]),
                      full(a1), full(prepared["w2"]), full(prepared["b2"])],
            out_specs=pl.BlockSpec((2, n2), lambda i: (0, 0))),
        compiler_params=seq,
    )(x, prepared["w1"], prepared["b1"], a1, prepared["w2"], prepared["b2"])
    a2 = _finalize_affine(s2, prepared["g2"], prepared["be2"], B)

    # Pass 3: normalize + output Linear; batch-parallel (v7x dual-TC sharding).
    out = pl.pallas_call(
        _output_kernel,
        out_shape=jax.ShapeDtypeStruct((B, n_out), jnp.float32),
        grid_spec=pltpu.PrefetchScalarGridSpec(
            num_scalar_prefetch=0, grid=(nb,),
            in_specs=[x_spec, full(prepared["w1"]), full(prepared["b1"]),
                      full(a1), full(prepared["w2"]), full(prepared["b2"]),
                      full(a2), full(prepared["wo"]), full(prepared["bo"])],
            out_specs=pl.BlockSpec((tb, n_out), lambda i: (i, 0))),
        compiler_params=par,
    )(x, prepared["w1"], prepared["b1"], a1, prepared["w2"], prepared["b2"],
      a2, prepared["wo"], prepared["bo"])
    return out


# ------------------------- reference & initializers ------------------------ #

def _reference_forward(x, params):
    """Pure-JAX reference with the exact torch forward semantics."""
    def block(h, w, b, g, be):
        z = jnp.maximum(h @ w.T + b, 0.0)
        mean = jnp.mean(z, axis=0, keepdims=True)
        var = jnp.mean((z - mean) ** 2, axis=0, keepdims=True)
        return (z - mean) / jnp.sqrt(var + BN_EPS) * g + be

    h = block(x, params["w1"], params["b1"], params["g1"], params["be1"])
    h = block(h, params["w2"], params["b2"], params["g2"], params["be2"])
    return h @ params["wo"].T + params["bo"]


def init_params(key, in_features, num_nodes, out_features):
    """Deterministic init matching torch:
       - Block Linear weight: kaiming_normal_(nonlinearity='relu')
       - Block Linear bias:   U(-1/sqrt(fan_in), 1/sqrt(fan_in))
       - BatchNorm1d:         gamma=1, beta=0
       - Output Linear:       torch default U(-1/sqrt(fan_in), ...) for W and b
    """
    n1, n2 = num_nodes
    keys = jax.random.split(key, 6)

    def kaiming_normal(k, shape):  # shape = (out, in)
        fan_in = shape[1]
        return jax.random.normal(k, shape, jnp.float32) * jnp.sqrt(2.0 / fan_in)

    def uniform(k, shape, fan_in):
        bound = 1.0 / jnp.sqrt(fan_in)
        return jax.random.uniform(k, shape, jnp.float32, -bound, bound)

    return {
        "w1": kaiming_normal(keys[0], (n1, in_features)),
        "b1": uniform(keys[1], (1, n1), in_features),
        "g1": jnp.ones((1, n1), jnp.float32),
        "be1": jnp.zeros((1, n1), jnp.float32),
        "w2": kaiming_normal(keys[2], (n2, n1)),
        "b2": uniform(keys[3], (1, n2), n1),
        "g2": jnp.ones((1, n2), jnp.float32),
        "be2": jnp.zeros((1, n2), jnp.float32),
        "wo": uniform(keys[4], (out_features, n2), n2),
        "bo": uniform(keys[5], (1, out_features), n2),
    }


if __name__ == "__main__":
    in_features = 16
    num_nodes = (32, 32)
    out_features = 1
    batch = 256

    key = jax.random.PRNGKey(0)
    kx, kp = jax.random.split(key)
    x = jax.random.normal(kx, (batch, in_features), jnp.float32)
    params = init_params(kp, in_features, num_nodes, out_features)
    ref = _reference_forward(x, params)

    # f32 MXU feed: exact parity with the torch forward.  batch_tile=64 forces
    # a 4-tile grid so the tiled-stats / pipelined path is exercised.
    prepared = prepare_params(params, mxu_dtype=jnp.float32)
    out = jax.block_until_ready(mlp_vanilla_forward(x, prepared, batch_tile=64))
    assert out.shape == (batch, out_features), out.shape
    assert bool(jnp.all(jnp.isfinite(out)))
    assert bool(jnp.allclose(out, ref, rtol=2e-4, atol=2e-4)), (
        float(jnp.max(jnp.abs(out - ref))))

    # bf16 MXU feed (recommended on v5e; faster on v6e/v7x): sanity check only.
    prepared_bf16 = prepare_params(params, mxu_dtype=jnp.bfloat16)
    out_bf16 = jax.block_until_ready(mlp_vanilla_forward(x, prepared_bf16))
    assert out_bf16.shape == (batch, out_features)
    assert bool(jnp.all(jnp.isfinite(out_bf16)))
    assert float(jnp.max(jnp.abs(out_bf16 - ref))) < 0.5

    print("KERNEL_OK")
</pallas_src>

<mosaic_0001>
module attributes {stable_mosaic.version = 11 : i64} {
  func.func @_stats_l1_kernel(%arg0: i32, %arg1: memref<64x16xf32, #tpu.memory_space<vmem>>, %arg2: memref<16x32xf32, #tpu.memory_space<vmem>>, %arg3: memref<1x32xf32, #tpu.memory_space<vmem>>, %arg4: memref<2x32xf32, #tpu.memory_space<vmem>>) attributes {dimension_semantics = [#tpu.dimension_semantics<arbitrary>], iteration_bounds = array<i64: 4>, scalar_prefetch = 0 : i64, scratch_operands = 0 : i64, tpu.core_type = #tpu.core_type<tc>, window_params = [{transform_indices = @transform_0, window_bounds = array<i64: 64, 16>}, {pipeline_mode = #tpu.pipeline_mode<synchronous>, transform_indices = @transform_1, window_bounds = array<i64: 16, 32>}, {pipeline_mode = #tpu.pipeline_mode<synchronous>, transform_indices = @transform_2, window_bounds = array<i64: 1, 32>}, {pipeline_mode = #tpu.pipeline_mode<synchronous>, transform_indices = @transform_3, window_bounds = array<i64: 2, 32>}]} {
    %c0 = arith.constant 0 : index
    %c0_0 = arith.constant 0 : index
    %0 = vector.load %arg1[%c0, %c0_0] : memref<64x16xf32, #tpu.memory_space<vmem>>, vector<64x16xf32>
    %c0_1 = arith.constant 0 : index
    %c0_2 = arith.constant 0 : index
    %1 = vector.load %arg2[%c0_1, %c0_2] : memref<16x32xf32, #tpu.memory_space<vmem>>, vector<16x32xf32>
    %cst = arith.constant dense<0.000000e+00> : vector<64x32xf32>
    %2 = tpu.matmul %0, %1, %cst {dimension_numbers = #tpu.dot_dimension_numbers<[1], [0], [0], [1], [0, 0, 1, 1], [], []>} : vector<64x16xf32>, vector<16x32xf32>, vector<64x32xf32> -> vector<64x32xf32>
    %c0_3 = arith.constant 0 : index
    %c0_4 = arith.constant 0 : index
    %3 = vector.load %arg3[%c0_3, %c0_4] : memref<1x32xf32, #tpu.memory_space<vmem>>, vector<1x32xf32>
    %4 = vector.broadcast %3 : vector<1x32xf32> to vector<64x32xf32>
    %5 = arith.addf %2, %4 : vector<64x32xf32>
    %cst_5 = arith.constant 0.000000e+00 : f32
    %6 = vector.broadcast %cst_5 : f32 to vector<64x32xf32>
    %7 = arith.maximumf %5, %6 : vector<64x32xf32>
    %c0_i32 = arith.constant 0 : i32
    %8 = arith.cmpi eq, %arg0, %c0_i32 : i32
    %9 = arith.extui %8 : i1 to i32
    %c0_i32_6 = arith.constant 0 : i32
    %10 = arith.cmpi ne, %9, %c0_i32_6 : i32
    scf.if %10 {
      %cst_16 = arith.constant 0.000000e+00 : f32
      %22 = vector.broadcast %cst_16 : f32 to vector<2x32xf32>
      %c0_17 = arith.constant 0 : index
      %c0_18 = arith.constant 0 : index
      %23 = vector.load %arg4[%c0_17, %c0_18] : memref<2x32xf32, #tpu.memory_space<vmem>>, vector<2x32xf32>
      tpu.vector_store %arg4[%c0_17, %c0_18], %22 {strides = array<i32>} : memref<2x32xf32, #tpu.memory_space<vmem>>, vector<2x32xf32>,
    } else {
    }
    %c0_7 = arith.constant 0 : index
    %c0_8 = arith.constant 0 : index
    %11 = vector.load %arg4[%c0_7, %c0_8] : memref<2x32xf32, #tpu.memory_space<vmem>>, vector<1x32xf32>
    %cst_9 = arith.constant dense<0.000000e+00> : vector<32xf32>
    %12 = vector.multi_reduction <add>, %7, %cst_9 [0] : vector<64x32xf32> to vector<32xf32>
    %13 = vector.shape_cast %12 : vector<32xf32> to vector<1x32xf32>
    %14 = arith.addf %11, %13 : vector<1x32xf32>
    %c0_10 = arith.constant 0 : index
    %c0_11 = arith.constant 0 : index
    %15 = vector.load %arg4[%c0_10, %c0_11] : memref<2x32xf32, #tpu.memory_space<vmem>>, vector<1x32xf32>
    tpu.vector_store %arg4[%c0_10, %c0_11], %14 {strides = array<i32>} : memref<2x32xf32, #tpu.memory_space<vmem>>, vector<1x32xf32>,
    %c1 = arith.constant 1 : index
    %c0_12 = arith.constant 0 : index
    %16 = vector.load %arg4[%c1, %c0_12] : memref<2x32xf32, #tpu.memory_space<vmem>>, vector<1x32xf32>
    %17 = arith.mulf %7, %7 : vector<64x32xf32>
    %cst_13 = arith.constant dense<0.000000e+00> : vector<32xf32>
    %18 = vector.multi_reduction <add>, %17, %cst_13 [0] : vector<64x32xf32> to vector<32xf32>
    %19 = vector.shape_cast %18 : vector<32xf32> to vector<1x32xf32>
    %20 = arith.addf %16, %19 : vector<1x32xf32>
    %c1_14 = arith.constant 1 : index
    %c0_15 = arith.constant 0 : index
    %21 = vector.load %arg4[%c1_14, %c0_15] : memref<2x32xf32, #tpu.memory_space<vmem>>, vector<1x32xf32>
    tpu.vector_store %arg4[%c1_14, %c0_15], %20 {strides = array<i32>} : memref<2x32xf32, #tpu.memory_space<vmem>>, vector<1x32xf32>,
    return
  }
  func.func @transform_0(%arg0: i32) -> (i32, i32) {
    %c0_i32 = arith.constant 0 : i32
    %c0_i32_0 = arith.constant 0 : i32
    return %arg0, %c0_i32 : i32, i32
  }
  func.func @transform_1(%arg0: i32) -> (i32, i32) {
    %c0_i32 = arith.constant 0 : i32
    %c0_i32_0 = arith.constant 0 : i32
    %c0_i32_1 = arith.constant 0 : i32
    return %c0_i32, %c0_i32_0 : i32, i32
  }
  func.func @transform_2(%arg0: i32) -> (i32, i32) {
    %c0_i32 = arith.constant 0 : i32
    %c0_i32_0 = arith.constant 0 : i32
    %c0_i32_1 = arith.constant 0 : i32
    return %c0_i32, %c0_i32_0 : i32, i32
  }
  func.func @transform_3(%arg0: i32) -> (i32, i32) {
    %c0_i32 = arith.constant 0 : i32
    %c0_i32_0 = arith.constant 0 : i32
    %c0_i32_1 = arith.constant 0 : i32
    return %c0_i32, %c0_i32_0 : i32, i32
  }
}

module attributes {stable_mosaic.version = 11 : i64} {
  func.func @_output_kernel(%arg0: i32, %arg1: memref<64x16xf32, #tpu.memory_space<vmem>>, %arg2: memref<16x32xf32, #tpu.memory_space<vmem>>, %arg3: memref<1x32xf32, #tpu.memory_space<vmem>>, %arg4: memref<2x32xf32, #tpu.memory_space<vmem>>, %arg5: memref<32x32xf32, #tpu.memory_space<vmem>>, %arg6: memref<1x32xf32, #tpu.memory_space<vmem>>, %arg7: memref<2x32xf32, #tpu.memory_space<vmem>>, %arg8: memref<32x1xf32, #tpu.memory_space<vmem>>, %arg9: memref<1x1xf32, #tpu.memory_space<vmem>>, %arg10: memref<64x1xf32, #tpu.memory_space<vmem>>) attributes {dimension_semantics = [#tpu.dimension_semantics<parallel>], iteration_bounds = array<i64: 4>, scalar_prefetch = 0 : i64, scratch_operands = 0 : i64, tpu.core_type = #tpu.core_type<tc>, window_params = [{transform_indices = @transform_0, window_bounds = array<i64: 64, 16>}, {pipeline_mode = #tpu.pipeline_mode<synchronous>, transform_indices = @transform_1, window_bounds = array<i64: 16, 32>}, {pipeline_mode = #tpu.pipeline_mode<synchronous>, transform_indices = @transform_2, window_bounds = array<i64: 1, 32>}, {pipeline_mode = #tpu.pipeline_mode<synchronous>, transform_indices = @transform_3, window_bounds = array<i64: 2, 32>}, {pipeline_mode = #tpu.pipeline_mode<synchronous>, transform_indices = @transform_4, window_bounds = array<i64: 32, 32>}, {pipeline_mode = #tpu.pipeline_mode<synchronous>, transform_indices = @transform_5, window_bounds = array<i64: 1, 32>}, {pipeline_mode = #tpu.pipeline_mode<synchronous>, transform_indices = @transform_6, window_bounds = array<i64: 2, 32>}, {pipeline_mode = #tpu.pipeline_mode<synchronous>, transform_indices = @transform_7, window_bounds = array<i64: 32, 1>}, {pipeline_mode = #tpu.pipeline_mode<synchronous>, transform_indices = @transform_8, window_bounds = array<i64: 1, 1>}, {transform_indices = @transform_9, window_bounds = array<i64: 64, 1>}]} {
    %c0 = arith.constant 0 : index
    %c0_0 = arith.constant 0 : index
    %0 = vector.load %arg1[%c0, %c0_0] : memref<64x16xf32, #tpu.memory_space<vmem>>, vector<64x16xf32>
    %c0_1 = arith.constant 0 : index
    %c0_2 = arith.constant 0 : index
    %1 = vector.load %arg2[%c0_1, %c0_2] : memref<16x32xf32, #tpu.memory_space<vmem>>, vector<16x32xf32>
    %cst = arith.constant dense<0.000000e+00> : vector<64x32xf32>
    %2 = tpu.matmul %0, %1, %cst {dimension_numbers = #tpu.dot_dimension_numbers<[1], [0], [0], [1], [0, 0, 1, 1], [], []>} : vector<64x16xf32>, vector<16x32xf32>, vector<64x32xf32> -> vector<64x32xf32>
    %c0_3 = arith.constant 0 : index
    %c0_4 = arith.constant 0 : index
    %3 = vector.load %arg3[%c0_3, %c0_4] : memref<1x32xf32, #tpu.memory_space<vmem>>, vector<1x32xf32>
    %4 = vector.broadcast %3 : vector<1x32xf32> to vector<64x32xf32>
    %5 = arith.addf %2, %4 : vector<64x32xf32>
    %cst_5 = arith.constant 0.000000e+00 : f32
    %6 = vector.broadcast %cst_5 : f32 to vector<64x32xf32>
    %7 = arith.maximumf %5, %6 : vector<64x32xf32>
    %c0_6 = arith.constant 0 : index
    %c0_7 = arith.constant 0 : index
    %8 = vector.load %arg4[%c0_6, %c0_7] : memref<2x32xf32, #tpu.memory_space<vmem>>, vector<1x32xf32>
    %9 = vector.broadcast %8 : vector<1x32xf32> to vector<64x32xf32>
    %10 = arith.mulf %7, %9 : vector<64x32xf32>
    %c1 = arith.constant 1 : index
    %c0_8 = arith.constant 0 : index
    %11 = vector.load %arg4[%c1, %c0_8] : memref<2x32xf32, #tpu.memory_space<vmem>>, vector<1x32xf32>
    %12 = vector.broadcast %11 : vector<1x32xf32> to vector<64x32xf32>
    %13 = arith.addf %10, %12 : vector<64x32xf32>
    %c0_9 = arith.constant 0 : index
    %c0_10 = arith.constant 0 : index
    %14 = vector.load %arg5[%c0_9, %c0_10] : memref<32x32xf32, #tpu.memory_space<vmem>>, vector<32x32xf32>
    %cst_11 = arith.constant dense<0.000000e+00> : vector<64x32xf32>
    %15 = tpu.matmul %13, %14, %cst_11 {dimension_numbers = #tpu.dot_dimension_numbers<[1], [0], [0], [1], [0, 0, 1, 1], [], []>} : vector<64x32xf32>, vector<32x32xf32>, vector<64x32xf32> -> vector<64x32xf32>
    %c0_12 = arith.constant 0 : index
    %c0_13 = arith.constant 0 : index
    %16 = vector.load %arg6[%c0_12, %c0_13] : memref<1x32xf32, #tpu.memory_space<vmem>>, vector<1x32xf32>
    %17 = vector.broadcast %16 : vector<1x32xf32> to vector<64x32xf32>
    %18 = arith.addf %15, %17 : vector<64x32xf32>
    %cst_14 = arith.constant 0.000000e+00 : f32
    %19 = vector.broadcast %cst_14 : f32 to vector<64x32xf32>
    %20 = arith.maximumf %18, %19 : vector<64x32xf32>
    %c0_15 = arith.constant 0 : index
    %c0_16 = arith.constant 0 : index
    %21 = vector.load %arg7[%c0_15, %c0_16] : memref<2x32xf32, #tpu.memory_space<vmem>>, vector<1x32xf32>
    %22 = vector.broadcast %21 : vector<1x32xf32> to vector<64x32xf32>
    %23 = arith.mulf %20, %22 : vector<64x32xf32>
    %c1_17 = arith.constant 1 : index
    %c0_18 = arith.constant 0 : index
    %24 = vector.load %arg7[%c1_17, %c0_18] : memref<2x32xf32, #tpu.memory_space<vmem>>, vector<1x32xf32>
    %25 = vector.broadcast %24 : vector<1x32xf32> to vector<64x32xf32>
    %26 = arith.addf %23, %25 : vector<64x32xf32>
    %c0_19 = arith.constant 0 : index
    %c0_20 = arith.constant 0 : index
    %27 = vector.load %arg8[%c0_19, %c0_20] : memref<32x1xf32, #tpu.memory_space<vmem>>, vector<32x1xf32>
    %cst_21 = arith.constant dense<0.000000e+00> : vector<64x1xf32>
    %28 = tpu.matmul %26, %27, %cst_21 {dimension_numbers = #tpu.dot_dimension_numbers<[1], [0], [0], [1], [0, 0, 1, 1], [], []>} : vector<64x32xf32>, vector<32x1xf32>, vector<64x1xf32> -> vector<64x1xf32>
    %c0_22 = arith.constant 0 : index
    %c0_23 = arith.constant 0 : index
    %29 = vector.load %arg9[%c0_22, %c0_23] : memref<1x1xf32, #tpu.memory_space<vmem>>, vector<1x1xf32>
    %30 = vector.broadcast %29 : vector<1x1xf32> to vector<64x1xf32>
    %31 = arith.addf %28, %30 : vector<64x1xf32>
    %c0_24 = arith.constant 0 : index
    %c0_25 = arith.constant 0 : index
    %32 = vector.load %arg10[%c0_24, %c0_25] : memref<64x1xf32, #tpu.memory_space<vmem>>, vector<64x1xf32>
    tpu.vector_store %arg10[%c0_24, %c0_25], %31 {strides = array<i32>} : memref<64x1xf32, #tpu.memory_space<vmem>>, vector<64x1xf32>,
    return
  }
  func.func @transform_0(%arg0: i32) -> (i32, i32) {
    %c0_i32 = arith.constant 0 : i32
    %c0_i32_0 = arith.constant 0 : i32
    return %arg0, %c0_i32 : i32, i32
  }
  func.func @transform_1(%arg0: i32) -> (i32, i32) {
    %c0_i32 = arith.constant 0 : i32
    %c0_i32_0 = arith.constant 0 : i32
    %c0_i32_1 = arith.constant 0 : i32
    return %c0_i32, %c0_i32_0 : i32, i32
  }
  func.func @transform_2(%arg0: i32) -> (i32, i32) {
    %c0_i32 = arith.constant 0 : i32
    %c0_i32_0 = arith.constant 0 : i32
    %c0_i32_1 = arith.constant 0 : i32
    return %c0_i32, %c0_i32_0 : i32, i32
  }
  func.func @transform_3(%arg0: i32) -> (i32, i32) {
    %c0_i32 = arith.constant 0 : i32
    %c0_i32_0 = arith.constant 0 : i32
    %c0_i32_1 = arith.constant 0 : i32
    return %c0_i32, %c0_i32_0 : i32, i32
  }
  func.func @transform_4(%arg0: i32) -> (i32, i32) {
    %c0_i32 = arith.constant 0 : i32
    %c0_i32_0 = arith.constant 0 : i32
    %c0_i32_1 = arith.constant 0 : i32
    return %c0_i32, %c0_i32_0 : i32, i32
  }
  func.func @transform_5(%arg0: i32) -> (i32, i32) {
    %c0_i32 = arith.constant 0 : i32
    %c0_i32_0 = arith.constant 0 : i32
    %c0_i32_1 = arith.constant 0 : i32
    return %c0_i32, %c0_i32_0 : i32, i32
  }
  func.func @transform_6(%arg0: i32) -> (i32, i32) {
    %c0_i32 = arith.constant 0 : i32
    %c0_i32_0 = arith.constant 0 : i32
    %c0_i32_1 = arith.constant 0 : i32
    return %c0_i32, %c0_i32_0 : i32, i32
  }
  func.func @transform_7(%arg0: i32) -> (i32, i32) {
    %c0_i32 = arith.constant 0 : i32
    %c0_i32_0 = arith.constant 0 : i32
    %c0_i32_1 = arith.constant 0 : i32
    return %c0_i32, %c0_i32_0 : i32, i32
  }
  func.func @transform_8(%arg0: i32) -> (i32, i32) {
    %c0_i32 = arith.constant 0 : i32
    %c0_i32_0 = arith.constant 0 : i32
    %c0_i32_1 = arith.constant 0 : i32
    return %c0_i32, %c0_i32_0 : i32, i32
  }
  func.func @transform_9(%arg0: i32) -> (i32, i32) {
    %c0_i32 = arith.constant 0 : i32
    %c0_i32_0 = arith.constant 0 : i32
    return %arg0, %c0_i32 : i32, i32
  }
}

module attributes {stable_mosaic.version = 11 : i64} {
  func.func @_stats_l2_kernel(%arg0: i32, %arg1: memref<64x16xf32, #tpu.memory_space<vmem>>, %arg2: memref<16x32xf32, #tpu.memory_space<vmem>>, %arg3: memref<1x32xf32, #tpu.memory_space<vmem>>, %arg4: memref<2x32xf32, #tpu.memory_space<vmem>>, %arg5: memref<32x32xf32, #tpu.memory_space<vmem>>, %arg6: memref<1x32xf32, #tpu.memory_space<vmem>>, %arg7: memref<2x32xf32, #tpu.memory_space<vmem>>) attributes {dimension_semantics = [#tpu.dimension_semantics<arbitrary>], iteration_bounds = array<i64: 4>, scalar_prefetch = 0 : i64, scratch_operands = 0 : i64, tpu.core_type = #tpu.core_type<tc>, window_params = [{transform_indices = @transform_0, window_bounds = array<i64: 64, 16>}, {pipeline_mode = #tpu.pipeline_mode<synchronous>, transform_indices = @transform_1, window_bounds = array<i64: 16, 32>}, {pipeline_mode = #tpu.pipeline_mode<synchronous>, transform_indices = @transform_2, window_bounds = array<i64: 1, 32>}, {pipeline_mode = #tpu.pipeline_mode<synchronous>, transform_indices = @transform_3, window_bounds = array<i64: 2, 32>}, {pipeline_mode = #tpu.pipeline_mode<synchronous>, transform_indices = @transform_4, window_bounds = array<i64: 32, 32>}, {pipeline_mode = #tpu.pipeline_mode<synchronous>, transform_indices = @transform_5, window_bounds = array<i64: 1, 32>}, {pipeline_mode = #tpu.pipeline_mode<synchronous>, transform_indices = @transform_6, window_bounds = array<i64: 2, 32>}]} {
    %c0 = arith.constant 0 : index
    %c0_0 = arith.constant 0 : index
    %0 = vector.load %arg1[%c0, %c0_0] : memref<64x16xf32, #tpu.memory_space<vmem>>, vector<64x16xf32>
    %c0_1 = arith.constant 0 : index
    %c0_2 = arith.constant 0 : index
    %1 = vector.load %arg2[%c0_1, %c0_2] : memref<16x32xf32, #tpu.memory_space<vmem>>, vector<16x32xf32>
    %cst = arith.constant dense<0.000000e+00> : vector<64x32xf32>
    %2 = tpu.matmul %0, %1, %cst {dimension_numbers = #tpu.dot_dimension_numbers<[1], [0], [0], [1], [0, 0, 1, 1], [], []>} : vector<64x16xf32>, vector<16x32xf32>, vector<64x32xf32> -> vector<64x32xf32>
    %c0_3 = arith.constant 0 : index
    %c0_4 = arith.constant 0 : index
    %3 = vector.load %arg3[%c0_3, %c0_4] : memref<1x32xf32, #tpu.memory_space<vmem>>, vector<1x32xf32>
    %4 = vector.broadcast %3 : vector<1x32xf32> to vector<64x32xf32>
    %5 = arith.addf %2, %4 : vector<64x32xf32>
    %cst_5 = arith.constant 0.000000e+00 : f32
    %6 = vector.broadcast %cst_5 : f32 to vector<64x32xf32>
    %7 = arith.maximumf %5, %6 : vector<64x32xf32>
    %c0_6 = arith.constant 0 : index
    %c0_7 = arith.constant 0 : index
    %8 = vector.load %arg4[%c0_6, %c0_7] : memref<2x32xf32, #tpu.memory_space<vmem>>, vector<1x32xf32>
    %9 = vector.broadcast %8 : vector<1x32xf32> to vector<64x32xf32>
    %10 = arith.mulf %7, %9 : vector<64x32xf32>
    %c1 = arith.constant 1 : index
    %c0_8 = arith.constant 0 : index
    %11 = vector.load %arg4[%c1, %c0_8] : memref<2x32xf32, #tpu.memory_space<vmem>>, vector<1x32xf32>
    %12 = vector.broadcast %11 : vector<1x32xf32> to vector<64x32xf32>
    %13 = arith.addf %10, %12 : vector<64x32xf32>
    %c0_9 = arith.constant 0 : index
    %c0_10 = arith.constant 0 : index
    %14 = vector.load %arg5[%c0_9, %c0_10] : memref<32x32xf32, #tpu.memory_space<vmem>>, vector<32x32xf32>
    %cst_11 = arith.constant dense<0.000000e+00> : vector<64x32xf32>
    %15 = tpu.matmul %13, %14, %cst_11 {dimension_numbers = #tpu.dot_dimension_numbers<[1], [0], [0], [1], [0, 0, 1, 1], [], []>} : vector<64x32xf32>, vector<32x32xf32>, vector<64x32xf32> -> vector<64x32xf32>
    %c0_12 = arith.constant 0 : index
    %c0_13 = arith.constant 0 : index
    %16 = vector.load %arg6[%c0_12, %c0_13] : memref<1x32xf32, #tpu.memory_space<vmem>>, vector<1x32xf32>
    %17 = vector.broadcast %16 : vector<1x32xf32> to vector<64x32xf32>
    %18 = arith.addf %15, %17 : vector<64x32xf32>
    %cst_14 = arith.constant 0.000000e+00 : f32
    %19 = vector.broadcast %cst_14 : f32 to vector<64x32xf32>
    %20 = arith.maximumf %18, %19 : vector<64x32xf32>
    %c0_i32 = arith.constant 0 : i32
    %21 = arith.cmpi eq, %arg0, %c0_i32 : i32
    %22 = arith.extui %21 : i1 to i32
    %c0_i32_15 = arith.constant 0 : i32
    %23 = arith.cmpi ne, %22, %c0_i32_15 : i32
    scf.if %23 {
      %cst_26 = arith.constant 0.000000e+00 : f32
      %35 = vector.broadcast %cst_26 : f32 to vector<2x32xf32>
      %c0_27 = arith.constant 0 : index
      %c0_28 = arith.constant 0 : index
      %36 = vector.load %arg7[%c0_27, %c0_28] : memref<2x32xf32, #tpu.memory_space<vmem>>, vector<2x32xf32>
      tpu.vector_store %arg7[%c0_27, %c0_28], %35 {strides = array<i32>} : memref<2x32xf32, #tpu.memory_space<vmem>>, vector<2x32xf32>,
    } else {
    }
    %c0_16 = arith.constant 0 : index
    %c0_17 = arith.constant 0 : index
    %24 = vector.load %arg7[%c0_16, %c0_17] : memref<2x32xf32, #tpu.memory_space<vmem>>, vector<1x32xf32>
    %cst_18 = arith.constant dense<0.000000e+00> : vector<32xf32>
    %25 = vector.multi_reduction <add>, %20, %cst_18 [0] : vector<64x32xf32> to vector<32xf32>
    %26 = vector.shape_cast %25 : vector<32xf32> to vector<1x32xf32>
    %27 = arith.addf %24, %26 : vector<1x32xf32>
    %c0_19 = arith.constant 0 : index
    %c0_20 = arith.constant 0 : index
    %28 = vector.load %arg7[%c0_19, %c0_20] : memref<2x32xf32, #tpu.memory_space<vmem>>, vector<1x32xf32>
    tpu.vector_store %arg7[%c0_19, %c0_20], %27 {strides = array<i32>} : memref<2x32xf32, #tpu.memory_space<vmem>>, vector<1x32xf32>,
    %c1_21 = arith.constant 1 : index
    %c0_22 = arith.constant 0 : index
    %29 = vector.load %arg7[%c1_21, %c0_22] : memref<2x32xf32, #tpu.memory_space<vmem>>, vector<1x32xf32>
    %30 = arith.mulf %20, %20 : vector<64x32xf32>
    %cst_23 = arith.constant dense<0.000000e+00> : vector<32xf32>
    %31 = vector.multi_reduction <add>, %30, %cst_23 [0] : vector<64x32xf32> to vector<32xf32>
    %32 = vector.shape_cast %31 : vector<32xf32> to vector<1x32xf32>
    %33 = arith.addf %29, %32 : vector<1x32xf32>
    %c1_24 = arith.constant 1 : index
    %c0_25 = arith.constant 0 : index
    %34 = vector.load %arg7[%c1_24, %c0_25] : memref<2x32xf32, #tpu.memory_space<vmem>>, vector<1x32xf32>
    tpu.vector_store %arg7[%c1_24, %c0_25], %33 {strides = array<i32>} : memref<2x32xf32, #tpu.memory_space<vmem>>, vector<1x32xf32>,
    return
  }
  func.func @transform_0(%arg0: i32) -> (i32, i32) {
    %c0_i32 = arith.constant 0 : i32
    %c0_i32_0 = arith.constant 0 : i32
    return %arg0, %c0_i32 : i32, i32
  }
  func.func @transform_1(%arg0: i32) -> (i32, i32) {
    %c0_i32 = arith.constant 0 : i32
    %c0_i32_0 = arith.constant 0 : i32
    %c0_i32_1 = arith.constant 0 : i32
    return %c0_i32, %c0_i32_0 : i32, i32
  }
  func.func @transform_2(%arg0: i32) -> (i32, i32) {
    %c0_i32 = arith.constant 0 : i32
    %c0_i32_0 = arith.constant 0 : i32
    %c0_i32_1 = arith.constant 0 : i32
    return %c0_i32, %c0_i32_0 : i32, i32
  }
  func.func @transform_3(%arg0: i32) -> (i32, i32) {
    %c0_i32 = arith.constant 0 : i32
    %c0_i32_0 = arith.constant 0 : i32
    %c0_i32_1 = arith.constant 0 : i32
    return %c0_i32, %c0_i32_0 : i32, i32
  }
  func.func @transform_4(%arg0: i32) -> (i32, i32) {
    %c0_i32 = arith.constant 0 : i32
    %c0_i32_0 = arith.constant 0 : i32
    %c0_i32_1 = arith.constant 0 : i32
    return %c0_i32, %c0_i32_0 : i32, i32
  }
  func.func @transform_5(%arg0: i32) -> (i32, i32) {
    %c0_i32 = arith.constant 0 : i32
    %c0_i32_0 = arith.constant 0 : i32
    %c0_i32_1 = arith.constant 0 : i32
    return %c0_i32, %c0_i32_0 : i32, i32
  }
  func.func @transform_6(%arg0: i32) -> (i32, i32) {
    %c0_i32 = arith.constant 0 : i32
    %c0_i32_0 = arith.constant 0 : i32
    %c0_i32_1 = arith.constant 0 : i32
    return %c0_i32, %c0_i32_0 : i32, i32
  }
}

</mosaic_0001>

<bundles_post_ra>
// kernel: mlp_vanilla_forward.3
= control target key start
LH: loop header
LB: loop body
LE: loop exit
PB: predicated region body
PF: predicated region fallthrough
CT: control target
= control target key end

     0   :  { %s493_s12 = smov 0   ;;  %s559_s0 = inlined_call_operand.vmem [shape: f32[256,16], index: 0, kind: input, shape index: {}]   ;;  %s560_s1 = inlined_call_operand.vmem [shape: f32[16,32], index: 1, kind: input, shape index: {}]   ;;  %s561_s2 = inlined_call_operand.vmem [shape: f32[1,32], index: 2, kind: input, shape index: {}]   ;;  %s562_s3 = inlined_call_operand.vmem [shape: f32[2,32], index: 3, kind: output, shape index: {}]  }
   0x1 LB: > { %s405_s13 = sadd.s32 4294967295, %s470_s12   ;;  %p408_p0 = scmp.ge.s32.totalorder %s470_s12, 1  ;;  %s470_s12 = sphi %s493_s12, %s13_s12  }
   0x2   : > { %p133_p1 = scmp.lt.s32.totalorder %s470_s12, 5 }
   0x4   : > { %p134_p2 = pnand %p408_p0, %p133_p1 }
   0x5   : > { %v166_v0 = vld [vmem:[%s560_s1] sm:$0xff] (!%p134_p2)  ;;  %v167_v1 = vld [vmem:[%s560_s1 + $0x8] sm:$0xff] (!%p134_p2)  ;;  %s409_s18 = sshll.u32 (!%p134_p2), %s405_s13, 3  ;;  %vm175_vm0 = vcmask (!%p134_p2), 130048   ;;  %p420_p4 = scmp.ne.s32.totalorder (!%p134_p2), %s405_s13, 0 }
   0x6   : > { %137 = sbr.rel (%p134_p2) target bundleno = 272 (0x110), region = 32  ;;  %v449_v2 = vpack.c.bf16 (!%p134_p2), %v167_v1, %v166_v0  ;;  %p153_p3 = scmp.lt.s32.totalorder (!%p134_p2), %s409_s18, 31  ;;  %v411_v11 = vld [vmem:[%s561_s2] ss:$0 sm:$0xff] (!%p134_p2) }
   0x8   : > { %450 = vmatprep.subr.bf16.mxu0 (!%p134_p2), %v449_v2  ;;  %453 = vmatprep.subr.bf16.mxu1 (!%p134_p2), %v449_v2 }
   0x9   : > { %452 = vmatpush3.bf16.msra.mxu0 (!%p134_p2), %v449_v2  ;;  %454 = vmatpush3.bf16.msra.mxu1 (!%p134_p2), %v449_v2 }
   0xd   : > { %s564_s18 = smov (!%p153_p3, %s409_s18), 31  ;;  %vm317_vm1 = vcmask (!%p420_p4), 254976   ;;  %v472_v36 = vmov (!%p420_p4), 0.0  }
   0xe   : > { %s410_s19 = sshll.u32 %s564_s18, 3  ;;  %318 = vst.msk [vmem:[%s562_s3] sm:$0x3] (!%p420_p4), %vm317_vm1, %v472_v36 }
   0xf   : > { %s156_s22 = scalar_lea.vmem %s559_s0, %s410_s19 }
  0x10   : > { %v158_v3 = vld [vmem:[%s156_s22] sm:$0xff]  ;;  %v159_v5 = vld [vmem:[%s156_s22 + $0x8] sm:$0xff]  ;;  %v160_v7 = vld [vmem:[%s156_s22 + $0x10] sm:$0xff] }
  0x11   : > { %v162_v4 = vld [vmem:[%s156_s22 + $0x20] sm:$0xff]  ;;  %437 = vmatprep.mubr.msk.f32.mxu0 %vm175_vm0, %v158_v3  ;;  %v163_v6 = vld [vmem:[%s156_s22 + $0x28] sm:$0xff]  ;;  %v164_v8 = vld [vmem:[%s156_s22 + $0x30] sm:$0xff] }
  0x12   : > { %443 = vmatprep.mubr.msk.f32.mxu1 %vm175_vm0, %v162_v4  ;;  %438 = vmatmul.mubr.msk.f32.vlgmr.msra.gmra.mrb[0].mxu0 %vm175_vm0, %v159_v5  ;;  %v161_v9 = vld [vmem:[%s156_s22 + $0x18] sm:$0xff] }
  0x13   : > { %444 = vmatmul.mubr.msk.f32.vlgmr.msra.gmra.mrb[0].mxu1 %vm175_vm0, %v163_v6  ;;  %440 = vmatprep.mubr.msk.f32.mxu0 %vm175_vm0, %v160_v7  ;;  %v165_v10 = vld [vmem:[%s156_s22 + $0x38] sm:$0xff] }
  0x14   : > { %446 = vmatprep.mubr.msk.f32.mxu1 %vm175_vm0, %v164_v8 }
  0x16   : > { %441 = vmatmul.mubr.msk.f32.gmra.mrb[2].mxu0 %vm175_vm0, %v161_v9 }
  0x17   : > { %447 = vmatmul.mubr.msk.f32.gmra.mrb[2].mxu1 %vm175_vm0, %v165_v10 }
  0xe5   : > { %v439_v12 = vpop.f32.mrb[0].mxu0 }
  0xe6   : > { %v445_v13 = vpop.f32.mrb[0].mxu1  ;;  %v272_v14 = vadd.f32 %v439_v12, %v411_v11  ;;  %v266_v16 = vpop.f32.mrb[1].mxu0 }
  0xe7   : > { %v292_v15 = vadd.f32 %v445_v13, %v411_v11  ;;  %v286_v17 = vpop.f32.mrb[1].mxu1  ;;  %v267_v18 = vadd.f32 %v411_v11, %v266_v16 }
  0xe8   : > { %v287_v19 = vadd.f32 %v411_v11, %v286_v17  ;;  %v306_v20 = vmax.f32 %v272_v14, 0.0  ;;  %316 = sbr.rel (%p420_p4) target bundleno = 239 (0xef), region = 36 }
  0xe9   : > { %v310_v21 = vmax.f32 %v292_v15, 0.0  ;;  %v305_v22 = vmax.f32 %v267_v18, 0.0  ;;  %v442_v24 = vpop.f32.mrb[2].mxu0 }
  0xea   : > { %v309_v23 = vmax.f32 %v287_v19, 0.0  ;;  %v448_v25 = vpop.f32.mrb[2].mxu1  ;;  %v282_v26 = vadd.f32 %v442_v24, %v411_v11  ;;  %v276_v28 = vpop.f32.mrb[3].mxu0 }
  0xeb   : > { %v302_v27 = vadd.f32 %v448_v25, %v411_v11  ;;  %v296_v29 = vpop.f32.mrb[3].mxu1  ;;  %v277_v30 = vadd.f32 %v411_v11, %v276_v28 }
  0xec   : > { %v297_v31 = vadd.f32 %v411_v11, %v296_v29  ;;  %v308_v32 = vmax.f32 %v282_v26, 0.0 }
  0xed   : > { %v312_v33 = vmax.f32 %v302_v27, 0.0  ;;  %v307_v34 = vmax.f32 %v277_v30, 0.0 }
  0xee   : > { %v311_v35 = vmax.f32 %v297_v31, 0.0 }
  0xef PF: > { %vm320_vm2 = vcmask 261120   ;;  %v346_v37 = vmul.f32 %v305_v22, %v305_v22  ;;  %v347_v41 = vmul.f32 %v306_v20, %v306_v20  ;;  %v348_v44 = vmul.f32 %v307_v34, %v307_v34  ;;  %v319_v19 = vld [vmem:[%s562_s3] sm:$0x1]  ;;  %v345_v24 = vld [vmem:[%s562_s3 + $0x1] sm:$0x1] }
  0xf0   : > { %v321_v38 = vsel %vm320_vm2, %v305_v22, 0.0  ;;  %v322_v39 = vsel %vm320_vm2, %v306_v20, 0.0  ;;  %v324_v40 = vsel %vm320_vm2, %v307_v34, 0.0  ;;  %v326_v43 = vsel %vm320_vm2, %v308_v32, 0.0 }
  0xf1   : > { %v323_v42 = vadd.f32 %v322_v39, %v321_v38  ;;  %v349_v45 = vmul.f32 %v308_v32, %v308_v32  ;;  %v328_v47 = vsel %vm320_vm2, %v309_v23, 0.0  ;;  %v350_v48 = vmul.f32 %v309_v23, %v309_v23 }
  0xf2   : > { %v354_v49 = vsel %vm320_vm2, %v346_v37, 0.0  ;;  %v355_v50 = vsel %vm320_vm2, %v347_v41, 0.0  ;;  %v357_v51 = vsel %vm320_vm2, %v348_v44, 0.0  ;;  %v330_v54 = vsel %vm320_vm2, %v310_v21, 0.0 }
  0xf3   : > { %v325_v46 = vadd.f32 %v324_v40, %v323_v42  ;;  %v356_v53 = vadd.f32 %v355_v50, %v354_v49  ;;  %v351_v55 = vmul.f32 %v310_v21, %v310_v21  ;;  %v359_v56 = vsel %vm320_vm2, %v349_v45, 0.0 }
  0xf4   : > { %v332_v59 = vsel %vm320_vm2, %v311_v35, 0.0  ;;  %v352_v60 = vmul.f32 %v311_v35, %v311_v35  ;;  %v361_v61 = vsel %vm320_vm2, %v350_v48, 0.0  ;;  %v334_v0 = vsel %vm320_vm2, %v312_v33, 0.0 }
  0xf5   : > { %v327_v52 = vadd.f32 %v326_v43, %v325_v46  ;;  %v358_v58 = vadd.f32 %v357_v51, %v356_v53  ;;  %v353_v1 = vmul.f32 %v312_v33, %v312_v33  ;;  %v363_v2 = vsel %vm320_vm2, %v351_v55, 0.0 }
  0xf6   : > { %v365_v5 = vsel %vm320_vm2, %v352_v60, 0.0  ;;  %vm343_vm3 = vcmask 253952  }
  0xf7   : > { %v329_v57 = vadd.f32 %v328_v47, %v327_v52  ;;  %v360_v63 = vadd.f32 %v359_v56, %v358_v58  ;;  %v367_v8 = vsel %vm320_vm2, %v353_v1, 0.0 }
  0xf9   : > { %v331_v62 = vadd.f32 %v330_v54, %v329_v57  ;;  %v362_v4 = vadd.f32 %v361_v61, %v360_v63 }
  0xfb   : > { %v333_v3 = vadd.f32 %v332_v59, %v331_v62  ;;  %v364_v7 = vadd.f32 %v363_v2, %v362_v4 }
  0xfd   : > { %v335_v6 = vadd.f32 %v334_v0, %v333_v3  ;;  %v366_v10 = vadd.f32 %v365_v5, %v364_v7 }
  0xff   : > { %v336_v9 = vrot.slane %v335_v6, 4  ;;  %v368_v12 = vadd.f32 %v367_v8, %v366_v10 }
 0x101   : > { %v337_v11 = vadd.f32 %v336_v9, %v335_v6  ;;  %v369_v14 = vrot.slane %v368_v12, 4 }
 0x103   : > { %v338_v13 = vrot.slane %v337_v11, 2  ;;  %v370_v16 = vadd.f32 %v369_v14, %v368_v12 }
 0x105   : > { %v339_v15 = vadd.f32 %v338_v13, %v337_v11  ;;  %v371_v18 = vrot.slane %v370_v16, 2 }
 0x107   : > { %v340_v17 = vrot.slane %v339_v15, 1  ;;  %v372_v21 = vadd.f32 %v371_v18, %v370_v16 }
 0x109   : > { %v341_v20 = vadd.f32 %v340_v17, %v339_v15  ;;  %v373_v23 = vrot.slane %v372_v21, 1 }
 0x10b   : > { %v342_v22 = vadd.f32 %v341_v20, %v319_v19  ;;  %v374_v25 = vadd.f32 %v373_v23, %v372_v21 }
 0x10d   : > { %344 = vst.msk [vmem:[%s562_s3] sm:$0x1] %vm343_vm3, %v342_v22  ;;  %v375_v26 = vadd.f32 %v374_v25, %v345_v24 }
 0x10f   : > { %376 = vst.msk [vmem:[%s562_s3 + $0x1] sm:$0x1] %vm343_vm3, %v375_v26 }
 0x110 PF: > { %s13_s12 = sadd.s32 1, %s470_s12  }
 0x111   : > { %p10_p5 = scmp.ge.s32.totalorder %s13_s12, 6  }
 0x113   :  { %12 = sbr.rel (!%p10_p5) target bundleno = 1 (0x1), region = 62 }

// kernel: mlp_vanilla_forward.4
= control target key start
LH: loop header
LB: loop body
LE: loop exit
PB: predicated region body
PF: predicated region fallthrough
CT: control target
= control target key end

     0   :  { %s812_s21 = smov 0   ;;  %s907_s0 = inlined_call_operand.vmem [shape: f32[256,16], index: 0, kind: input, shape index: {}]   ;;  %s908_s1 = inlined_call_operand.vmem [shape: f32[16,32], index: 1, kind: input, shape index: {}]   ;;  %s909_s2 = inlined_call_operand.vmem [shape: f32[1,32], index: 2, kind: input, shape index: {}]   ;;  %s910_s3 = inlined_call_operand.vmem [shape: f32[2,32], index: 3, kind: input, shape index: {}]   ;;  %s911_s4 = inlined_call_operand.vmem [shape: f32[32,32], index: 4, kind: input, shape index: {}]   ;;  %s912_s5 = inlined_call_operand.vmem [shape: f32[1,32], index: 5, kind: input, shape index: {}]   ;;  %s913_s6 = inlined_call_operand.vmem [shape: f32[2,32], index: 6, kind: output, shape index: {}]  }
   0x1 LB: > { %s660_s22 = sadd.s32 4294967295, %s774_s21   ;;  %p663_p0 = scmp.ge.s32.totalorder %s774_s21, 1  ;;  %s774_s21 = sphi %s812_s21, %s16_s21  }
   0x2   : > { %p208_p1 = scmp.lt.s32.totalorder %s774_s21, 5 }
   0x4   : > { %p209_p2 = pnand %p663_p0, %p208_p1 }
   0x5   : > { %v247_v0 = vld [vmem:[%s908_s1] sm:$0xff] (!%p209_p2)  ;;  %v248_v1 = vld [vmem:[%s908_s1 + $0x8] sm:$0xff] (!%p209_p2)  ;;  %s664_s27 = sshll.u32 (!%p209_p2), %s660_s22, 3  ;;  %vm256_vm0 = vcmask (!%p209_p2), 130048   ;;  %v422_v14 = vld [vmem:[%s911_s4 + $0x10] sm:$0xff] (!%p209_p2)  ;;  %vm431_vm1 = vcmask (!%p209_p2), 261120  }
   0x6   : > { %212 = sbr.rel (%p209_p2) target bundleno = 501 (0x1f5), region = 44  ;;  %v747_v2 = vpack.c.bf16 (!%p209_p2), %v248_v1, %v247_v0  ;;  %p234_p3 = scmp.lt.s32.totalorder (!%p209_p2), %s664_s27, 31  ;;  %v420_v11 = vld [vmem:[%s911_s4] sm:$0xff] (!%p209_p2)  ;;  %v421_v12 = vld [vmem:[%s911_s4 + $0x8] sm:$0xff] (!%p209_p2)  ;;  %v423_v15 = vld [vmem:[%s911_s4 + $0x18] sm:$0xff] (!%p209_p2) }
   0x7   : > { %v751_v13 = vpack.c.bf16 (!%p209_p2), %v421_v12, %v420_v11  ;;  %v755_v16 = vpack.c.bf16 (!%p209_p2), %v423_v15, %v422_v14  ;;  %v666_v17 = vld [vmem:[%s909_s2] ss:$0 sm:$0xff] (!%p209_p2)  ;;  %v676_v27 = vld [vmem:[%s910_s3 + $0x1] ss:$0 sm:$0xff] (!%p209_p2)  ;;  %p686_p4 = scmp.ne.s32.totalorder (!%p209_p2), %s660_s22, 0 }
   0x8   : > { %748 = vmatprep.subr.bf16.mxu0 (!%p209_p2), %v747_v2  ;;  %v675_v21 = vld [vmem:[%s910_s3] ss:$0 sm:$0xff] (!%p209_p2) }
   0x9   : > { %750 = vmatpush3.bf16.msra.mxu0 (!%p209_p2), %v747_v2  ;;  %752 = vmatprep.subr.bf16.mxu1 (!%p209_p2), %v751_v13  ;;  %v677_v60 = vld [vmem:[%s912_s5] ss:$0 sm:$0xff] (!%p209_p2) }
   0xa   : > { %754 = vmatpush3.bf16.msra.mxu1 (!%p209_p2), %v751_v13 }
   0xb   : > { %756 = vmatprep.subr.bf16.mxu1 (!%p209_p2), %v755_v16 }
   0xd   : > { %s915_s27 = smov (!%p234_p3, %s664_s27), 31  ;;  %vm573_vm2 = vcmask (!%p686_p4), 254976  }
   0xe   : > { %s665_s28 = sshll.u32 %s915_s27, 3  ;;  %758 = vmatpush3.bf16.msra.mxu1 %v755_v16 }
   0xf   : > { %s237_s7 = scalar_lea.vmem %s907_s0, %s665_s28 }
  0x10   : > { %v239_v3 = vld [vmem:[%s237_s7] sm:$0xff]  ;;  %v240_v4 = vld [vmem:[%s237_s7 + $0x8] sm:$0xff]  ;;  %v241_v5 = vld [vmem:[%s237_s7 + $0x10] sm:$0xff] }
  0x11   : > { %715 = vmatprep.mubr.msk.f32.mxu0 %vm256_vm0, %v239_v3  ;;  %v242_v6 = vld [vmem:[%s237_s7 + $0x18] sm:$0xff]  ;;  %v243_v7 = vld [vmem:[%s237_s7 + $0x20] sm:$0xff]  ;;  %v244_v8 = vld [vmem:[%s237_s7 + $0x28] sm:$0xff] }
  0x12   : > { %716 = vmatmul.mubr.msk.f32.vlgmr.msra.gmra.mrb[0].mxu0 %vm256_vm0, %v240_v4  ;;  %v245_v9 = vld [vmem:[%s237_s7 + $0x30] sm:$0xff]  ;;  %v246_v10 = vld [vmem:[%s237_s7 + $0x38] sm:$0xff] }
  0x13   : > { %718 = vmatprep.mubr.msk.f32.mxu0 %vm256_vm0, %v241_v5 }
  0x16   : > { %719 = vmatmul.mubr.msk.f32.gmra.mrb[2].mxu0 %vm256_vm0, %v242_v6 }
  0x17   : > { %721 = vmatprep.mubr.msk.f32.mxu0 %vm256_vm0, %v243_v7 }
  0x1a   : > { %722 = vmatmul.mubr.msk.f32.gmra.mrb[4].mxu0 %vm256_vm0, %v244_v8 }
  0x1b   : > { %724 = vmatprep.mubr.msk.f32.mxu0 %vm256_vm0, %v245_v9 }
  0x1e   : > { %725 = vmatmul.mubr.msk.f32.gmra.mrb[6].mxu0 %vm256_vm0, %v246_v10 }
  0xe5   : > { %v717_v18 = vpop.f32.mrb[0].mxu0 }
  0xe6   : > { %v353_v19 = vadd.f32 %v717_v18, %v666_v17  ;;  %v347_v20 = vpop.f32.mrb[1].mxu0 }
  0xe7   : > { %v348_v22 = vadd.f32 %v666_v17, %v347_v20 }
  0xe8   : > { %v387_v23 = vmax.f32 %v353_v19, 0.0 }
  0xe9   : > { %v386_v24 = vmax.f32 %v348_v22, 0.0  ;;  %v720_v25 = vpop.f32.mrb[2].mxu0 }
  0xea   : > { %v400_v26 = vmul.f32 %v675_v21, %v387_v23  ;;  %v363_v28 = vadd.f32 %v720_v25, %v666_v17  ;;  %v357_v29 = vpop.f32.mrb[3].mxu0 }
  0xeb   : > { %v399_v30 = vmul.f32 %v675_v21, %v386_v24  ;;  %v358_v31 = vadd.f32 %v666_v17, %v357_v29 }
  0xec   : > { %v389_v32 = vmax.f32 %v363_v28, 0.0  ;;  %v413_v36 = vadd.f32 %v676_v27, %v400_v26 }
  0xed   : > { %v388_v33 = vmax.f32 %v358_v31, 0.0  ;;  %v723_v34 = vpop.f32.mrb[4].mxu0  ;;  %v412_v35 = vadd.f32 %v676_v27, %v399_v30 }
  0xee   : > { %v402_v37 = vmul.f32 %v675_v21, %v389_v32  ;;  %v373_v38 = vadd.f32 %v723_v34, %v666_v17  ;;  %v367_v39 = vpop.f32.mrb[5].mxu0 }
  0xef   : > { %v401_v40 = vmul.f32 %v675_v21, %v388_v33  ;;  %v368_v41 = vadd.f32 %v666_v17, %v367_v39  ;;  %735 = vmatprep.mubr.msk.f32.mxu1 %vm431_vm1, %v412_v35 }
  0xf0   : > { %v391_v42 = vmax.f32 %v373_v38, 0.0  ;;  %736 = vmatmul.mubr.msk.f32.vlgmr.msra.gmra.mrb[0].mxu1 %vm431_vm1, %v413_v36  ;;  %v415_v46 = vadd.f32 %v676_v27, %v402_v37 }
  0xf1   : > { %v414_v43 = vadd.f32 %v676_v27, %v401_v40  ;;  %v390_v44 = vmax.f32 %v368_v41, 0.0  ;;  %v726_v45 = vpop.f32.mrb[6].mxu0 }
  0xf2   : > { %v404_v47 = vmul.f32 %v675_v21, %v391_v42  ;;  %v383_v48 = vadd.f32 %v726_v45, %v666_v17  ;;  %v377_v49 = vpop.f32.mrb[7].mxu0 }
  0xf3   : > { %v403_v50 = vmul.f32 %v675_v21, %v390_v44  ;;  %v378_v51 = vadd.f32 %v666_v17, %v377_v49  ;;  %738 = vmatprep.mubr.msk.f32.mxu1 %vm431_vm1, %v414_v43 }
  0xf4   : > { %v393_v52 = vmax.f32 %v383_v48, 0.0  ;;  %739 = vmatmul.mubr.msk.f32.gmra.mrb[2].mxu1 %vm431_vm1, %v415_v46  ;;  %v417_v55 = vadd.f32 %v676_v27, %v404_v47 }
  0xf5   : > { %v416_v53 = vadd.f32 %v676_v27, %v403_v50  ;;  %v392_v54 = vmax.f32 %v378_v51, 0.0 }
  0xf6   : > { %v406_v56 = vmul.f32 %v675_v21, %v393_v52 }
  0xf7   : > { %v405_v57 = vmul.f32 %v675_v21, %v392_v54  ;;  %741 = vmatprep.mubr.msk.f32.mxu1 %vm431_vm1, %v416_v53  ;;  %v776_v21 = vmov (!%p686_p4), 0.0  }
  0xf8   : > { %742 = vmatmul.mubr.msk.f32.gmra.mrb[4].mxu1 %vm431_vm1, %v417_v55  ;;  %v419_v59 = vadd.f32 %v676_v27, %v406_v56  ;;  %574 = vst.msk [vmem:[%s913_s6] sm:$0x3] (!%p686_p4), %vm573_vm2, %v776_v21 }
  0xf9   : > { %v418_v58 = vadd.f32 %v676_v27, %v405_v57 }
  0xfb   : > { %744 = vmatprep.mubr.msk.f32.mxu1 %vm431_vm1, %v418_v58 }
  0xfc   : > { %745 = vmatmul.mubr.msk.f32.gmra.mrb[6].mxu1 %vm431_vm1, %v419_v59 }
 0x1c3   : > { %v737_v61 = vpop.f32.mrb[0].mxu1 }
 0x1c4   : > { %v528_v62 = vadd.f32 %v737_v61, %v677_v60  ;;  %v522_v63 = vpop.f32.mrb[1].mxu1 }
 0x1c5   : > { %v523_v0 = vadd.f32 %v677_v60, %v522_v63 }
 0x1c6   : > { %v562_v1 = vmax.f32 %v528_v62, 0.0 }
 0x1c7   : > { %v561_v2 = vmax.f32 %v523_v0, 0.0  ;;  %v740_v3 = vpop.f32.mrb[2].mxu1 }
 0x1c8   : > { %v538_v4 = vadd.f32 %v740_v3, %v677_v60  ;;  %v532_v5 = vpop.f32.mrb[3].mxu1 }
 0x1c9   : > { %v533_v6 = vadd.f32 %v677_v60, %v532_v5 }
 0x1ca   : > { %v564_v7 = vmax.f32 %v538_v4, 0.0 }
 0x1cb   : > { %v563_v8 = vmax.f32 %v533_v6, 0.0  ;;  %v743_v9 = vpop.f32.mrb[4].mxu1 }
 0x1cc   : > { %v548_v10 = vadd.f32 %v743_v9, %v677_v60  ;;  %v542_v11 = vpop.f32.mrb[5].mxu1 }
 0x1cd   : > { %v543_v12 = vadd.f32 %v677_v60, %v542_v11  ;;  %572 = sbr.rel (%p686_p4) target bundleno = 468 (0x1d4), region = 48 }
 0x1ce   : > { %v566_v13 = vmax.f32 %v548_v10, 0.0 }
 0x1cf   : > { %v565_v14 = vmax.f32 %v543_v12, 0.0  ;;  %v746_v15 = vpop.f32.mrb[6].mxu1 }
 0x1d0   : > { %v558_v16 = vadd.f32 %v746_v15, %v677_v60  ;;  %v552_v17 = vpop.f32.mrb[7].mxu1 }
 0x1d1   : > { %v553_v18 = vadd.f32 %v677_v60, %v552_v17 }
 0x1d2   : > { %v568_v19 = vmax.f32 %v558_v16, 0.0 }
 0x1d3   : > { %v567_v20 = vmax.f32 %v553_v18, 0.0 }
 0x1d4 PF: > { %v576_v22 = vsel %vm431_vm1, %v561_v2, 0.0  ;;  %v577_v23 = vsel %vm431_vm1, %v562_v1, 0.0  ;;  %v579_v24 = vsel %vm431_vm1, %v563_v8, 0.0  ;;  %v581_v26 = vsel %vm431_vm1, %v564_v7, 0.0  ;;  %v575_v3 = vld [vmem:[%s913_s6] sm:$0x1] }
 0x1d5   : > { %v578_v25 = vadd.f32 %v577_v23, %v576_v22  ;;  %v601_v27 = vmul.f32 %v561_v2, %v561_v2  ;;  %v602_v28 = vmul.f32 %v562_v1, %v562_v1  ;;  %v603_v30 = vmul.f32 %v563_v8, %v563_v8  ;;  %v600_v9 = vld [vmem:[%s913_s6 + $0x1] sm:$0x1] }
 0x1d6   : > { %v604_v31 = vmul.f32 %v564_v7, %v564_v7  ;;  %v583_v32 = vsel %vm431_vm1, %v565_v14, 0.0  ;;  %v605_v35 = vmul.f32 %v565_v14, %v565_v14  ;;  %v585_v38 = vsel %vm431_vm1, %v566_v13, 0.0 }
 0x1d7   : > { %v580_v29 = vadd.f32 %v579_v24, %v578_v25  ;;  %v609_v33 = vsel %vm431_vm1, %v601_v27, 0.0  ;;  %v610_v36 = vsel %vm431_vm1, %v602_v28, 0.0  ;;  %v612_v37 = vsel %vm431_vm1, %v603_v30, 0.0 }
 0x1d8   : > { %v611_v39 = vadd.f32 %v610_v36, %v609_v33  ;;  %v606_v41 = vmul.f32 %v566_v13, %v566_v13  ;;  %v614_v42 = vsel %vm431_vm1, %v604_v31, 0.0  ;;  %v587_v43 = vsel %vm431_vm1, %v567_v20, 0.0 }
 0x1d9   : > { %v582_v34 = vadd.f32 %v581_v26, %v580_v29  ;;  %v607_v46 = vmul.f32 %v567_v20, %v567_v20  ;;  %v616_v47 = vsel %vm431_vm1, %v605_v35, 0.0  ;;  %v589_v48 = vsel %vm431_vm1, %v568_v19, 0.0 }
 0x1da   : > { %v613_v44 = vadd.f32 %v612_v37, %v611_v39  ;;  %v608_v51 = vmul.f32 %v568_v19, %v568_v19  ;;  %v618_v52 = vsel %vm431_vm1, %v606_v41, 0.0  ;;  %vm598_vm3 = vcmask 253952  }
 0x1db   : > { %v584_v40 = vadd.f32 %v583_v32, %v582_v34  ;;  %v620_v55 = vsel %vm431_vm1, %v607_v46, 0.0 }
 0x1dc   : > { %v615_v49 = vadd.f32 %v614_v42, %v613_v44  ;;  %v622_v58 = vsel %vm431_vm1, %v608_v51, 0.0 }
 0x1dd   : > { %v586_v45 = vadd.f32 %v585_v38, %v584_v40 }
 0x1de   : > { %v617_v53 = vadd.f32 %v616_v47, %v615_v49 }
 0x1df   : > { %v588_v50 = vadd.f32 %v587_v43, %v586_v45 }
 0x1e0   : > { %v619_v56 = vadd.f32 %v618_v52, %v617_v53 }
 0x1e1   : > { %v590_v54 = vadd.f32 %v589_v48, %v588_v50 }
 0x1e2   : > { %v621_v59 = vadd.f32 %v620_v55, %v619_v56 }
 0x1e3   : > { %v591_v57 = vrot.slane %v590_v54, 4 }
 0x1e4   : > { %v623_v61 = vadd.f32 %v622_v58, %v621_v59 }
 0x1e5   : > { %v592_v60 = vadd.f32 %v591_v57, %v590_v54 }
 0x1e6   : > { %v624_v63 = vrot.slane %v623_v61, 4 }
 0x1e7   : > { %v593_v62 = vrot.slane %v592_v60, 2 }
 0x1e8   : > { %v625_v1 = vadd.f32 %v624_v63, %v623_v61 }
 0x1e9   : > { %v594_v0 = vadd.f32 %v593_v62, %v592_v60 }
 0x1ea   : > { %v626_v4 = vrot.slane %v625_v1, 2 }
 0x1eb   : > { %v595_v2 = vrot.slane %v594_v0, 1 }
 0x1ec   : > { %v627_v6 = vadd.f32 %v626_v4, %v625_v1 }
 0x1ed   : > { %v596_v5 = vadd.f32 %v595_v2, %v594_v0 }
 0x1ee   : > { %v628_v8 = vrot.slane %v627_v6, 1 }
 0x1ef   : > { %v597_v7 = vadd.f32 %v596_v5, %v575_v3 }
 0x1f0   : > { %v629_v10 = vadd.f32 %v628_v8, %v627_v6 }
 0x1f1   : > { %599 = vst.msk [vmem:[%s913_s6] sm:$0x1] %vm598_vm3, %v597_v7 }
 0x1f2   : > { %v630_v11 = vadd.f32 %v629_v10, %v600_v9 }
 0x1f4   : > { %631 = vst.msk [vmem:[%s913_s6 + $0x1] sm:$0x1] %vm598_vm3, %v630_v11 }
 0x1f5 PF: > { %s16_s21 = sadd.s32 1, %s774_s21  }
 0x1f6   : > { %p13_p5 = scmp.ge.s32.totalorder %s16_s21, 6  }
 0x1f8   :  { %15 = sbr.rel (!%p13_p5) target bundleno = 1 (0x1), region = 74 }

// kernel: mlp_vanilla_forward.5
= control target key start
LH: loop header
LB: loop body
LE: loop exit
PB: predicated region body
PF: predicated region fallthrough
CT: control target
= control target key end

     0   :  { %s1122_s11 = smov 0   ;;  %s1226_s0 = inlined_call_operand.vmem [shape: f32[256,16], index: 0, kind: input, shape index: {}]   ;;  %s1227_s1 = inlined_call_operand.vmem [shape: f32[16,32], index: 1, kind: input, shape index: {}]   ;;  %s1228_s2 = inlined_call_operand.vmem [shape: f32[1,32], index: 2, kind: input, shape index: {}]   ;;  %s1229_s3 = inlined_call_operand.vmem [shape: f32[2,32], index: 3, kind: input, shape index: {}]   ;;  %s1230_s4 = inlined_call_operand.vmem [shape: f32[32,32], index: 4, kind: input, shape index: {}]   ;;  %s1231_s5 = inlined_call_operand.vmem [shape: f32[1,32], index: 5, kind: input, shape index: {}]   ;;  %s1232_s6 = inlined_call_operand.vmem [shape: f32[2,32], index: 6, kind: input, shape index: {}]   ;;  %s1233_s7 = inlined_call_operand.vmem [shape: f32[32,1], index: 7, kind: input, shape index: {}]   ;;  %s1234_s8 = inlined_call_operand.<no memory space> [shape: f32[1,1], index: 8, kind: input, shape index: {}]   ;;  %s1235_s9 = inlined_call_operand.vmem [shape: f32[256,1], index: 9, kind: output, shape index: {}]  }
   0x1   :  { %v14_v0 = vstv %s1234_s8 }
   0x2   :  { %15 = vst [vmem:[#allocation2] sm:$0x1] %v14_v0 }
   0x3 LB: > { %s899_s12 = sadd.s32 4294967295, %s1067_s11   ;;  %p903_p0 = scmp.ge.s32.totalorder %s1067_s11, 1  ;;  %s1067_s11 = sphi %s1122_s11, %s21_s11  }
   0x4   : > { %p290_p1 = scmp.lt.s32.totalorder %s1067_s11, 5 }
   0x6   : > { %p291_p2 = pnand %p903_p0, %p290_p1 }
   0x7   : > { %v346_v1 = vld [vmem:[%s1227_s1] sm:$0xff] (!%p291_p2)  ;;  %v347_v2 = vld [vmem:[%s1227_s1 + $0x8] sm:$0xff] (!%p291_p2)  ;;  %s904_s16 = sshll.u32 (!%p291_p2), %s899_s12, 3  ;;  %vm355_vm0 = vcmask (!%p291_p2), 130048   ;;  %v521_v15 = vld [vmem:[%s1230_s4 + $0x10] sm:$0xff] (!%p291_p2)  ;;  %vm530_vm1 = vcmask (!%p291_p2), 261120  }
   0x8   : > { %294 = sbr.rel (%p291_p2) target bundleno = 692 (0x2b4), region = 56  ;;  %v1031_v3 = vpack.c.bf16 (!%p291_p2), %v347_v2, %v346_v1  ;;  %p327_p3 = scmp.lt.s32.totalorder (!%p291_p2), %s904_s16, 31  ;;  %v519_v12 = vld [vmem:[%s1230_s4] sm:$0xff] (!%p291_p2)  ;;  %v520_v13 = vld [vmem:[%s1230_s4 + $0x8] sm:$0xff] (!%p291_p2)  ;;  %v522_v16 = vld [vmem:[%s1230_s4 + $0x18] sm:$0xff] (!%p291_p2)  ;;  %vm834_vm2 = vcmask (!%p291_p2), 7168  }
   0x9   : > { %v1035_v14 = vpack.c.bf16 (!%p291_p2), %v520_v13, %v519_v12  ;;  %v1039_v17 = vpack.c.bf16 (!%p291_p2), %v522_v16, %v521_v15  ;;  %v908_v18 = vld [vmem:[%s1228_s2] ss:$0 sm:$0xff] (!%p291_p2)  ;;  %v918_v32 = vld [vmem:[%s1229_s3 + $0x1] ss:$0 sm:$0xff] (!%p291_p2)  ;;  %v695_v62 = vld [vmem:[%s1233_s7 + $0x8] sm:$0xff] (!%p291_p2) }
   0xa   : > { %1032 = vmatprep.subr.bf16.mxu0 (!%p291_p2), %v1031_v3  ;;  %1051 = vmatprep.subr.bf16.mxu1 (!%p291_p2), %v1031_v3  ;;  %v917_v23 = vld [vmem:[%s1229_s3] ss:$0 sm:$0xff] (!%p291_p2)  ;;  %v696_v0 = vld [vmem:[%s1233_s7 + $0x10] sm:$0xff] (!%p291_p2)  ;;  %v697_v1 = vld [vmem:[%s1233_s7 + $0x18] sm:$0xff] (!%p291_p2) }
   0xb   : > { %1034 = vmatpush3.bf16.msra.mxu0 (!%p291_p2), %v1031_v3  ;;  %1052 = vmatpush3.bf16.msra.mxu1 (!%p291_p2), %v1031_v3  ;;  %v694_v61 = vld [vmem:[%s1233_s7] sm:$0xff] (!%p291_p2)  ;;  %v1047_v2 = vpack.c.bf16 (!%p291_p2), %v697_v1, %v696_v0 }
   0xc   : > { %1036 = vmatprep.subr.bf16.mxu1 (!%p291_p2), %v1035_v14  ;;  %v1043_v63 = vpack.c.bf16 (!%p291_p2), %v695_v62, %v694_v61  ;;  %v919_v3 = vld [vmem:[%s1231_s5] ss:$0 sm:$0xff] (!%p291_p2)  ;;  %v929_v13 = vld [vmem:[%s1232_s6 + $0x1] ss:$0 sm:$0xff] (!%p291_p2) }
   0xe   : > { %1044 = vmatprep.subr.bf16.mxu0 (!%p291_p2), %v1043_v63 }
   0xf   : > { %s1237_s16 = smov (!%p327_p3, %s904_s16), 31 }
  0x10   : > { %s905_s17 = sshll.u32 %s1237_s16, 3 }
  0x11   : > { %s330_s20 = scalar_lea.vmem %s1226_s0, %s905_s17  ;;  %s336_s12 = scalar_lea.vmem %s1235_s9, %s905_s17 }
  0x12   : > { %v338_v4 = vld [vmem:[%s330_s20] sm:$0xff]  ;;  %v339_v5 = vld [vmem:[%s330_s20 + $0x8] sm:$0xff]  ;;  %v340_v6 = vld [vmem:[%s330_s20 + $0x10] sm:$0xff] }
  0x13   : > { %979 = vmatprep.mubr.msk.f32.mxu0 %vm355_vm0, %v338_v4  ;;  %v342_v7 = vld [vmem:[%s330_s20 + $0x20] sm:$0xff]  ;;  %v343_v8 = vld [vmem:[%s330_s20 + $0x28] sm:$0xff]  ;;  %v344_v9 = vld [vmem:[%s330_s20 + $0x30] sm:$0xff] }
  0x14   : > { %980 = vmatmul.mubr.msk.f32.vlgmr.msra.gmra.mrb[0].mxu0 %vm355_vm0, %v339_v5  ;;  %985 = vmatprep.mubr.msk.f32.mxu1 %vm355_vm0, %v342_v7  ;;  %v341_v10 = vld [vmem:[%s330_s20 + $0x18] sm:$0xff]  ;;  %v928_v7 = vld [vmem:[%s1232_s6] ss:$0 sm:$0xff] }
  0x15   : > { %982 = vmatprep.mubr.msk.f32.mxu0 %vm355_vm0, %v340_v6  ;;  %986 = vmatmul.mubr.msk.f32.vlgmr.msra.gmra.mrb[0].mxu1 %vm355_vm0, %v343_v8  ;;  %v345_v11 = vld [vmem:[%s330_s20 + $0x38] sm:$0xff] }
  0x16   : > { %988 = vmatprep.mubr.msk.f32.mxu1 %vm355_vm0, %v344_v9  ;;  %1038 = vmatpush3.bf16.msra.mxu1 %v1035_v14 }
  0x17   : > { %1040 = vmatprep.subr.bf16.mxu1 %v1039_v17  ;;  %1046 = vmatpush3.bf16.msra.mxu0 %v1043_v63 }
  0x18   : > { %983 = vmatmul.mubr.msk.f32.gmra.mrb[2].mxu0 %vm355_vm0, %v341_v10  ;;  %1048 = vmatprep.subr.bf16.mxu0 %v1047_v2 }
  0x19   : > { %989 = vmatmul.mubr.msk.f32.gmra.mrb[2].mxu1 %vm355_vm0, %v345_v11 }
  0x1a   : > { %1042 = vmatpush3.bf16.msra.mxu1 %v1039_v17 }
  0x1b   : > { %1050 = vmatpush3.bf16.msra.mxu0 %v1047_v2 }
  0xe7   : > { %v981_v19 = vpop.f32.mrb[0].mxu0 }
  0xe8   : > { %v452_v20 = vadd.f32 %v981_v19, %v908_v18  ;;  %v446_v21 = vpop.f32.mrb[1].mxu0  ;;  %v987_v22 = vpop.f32.mrb[0].mxu1 }
  0xe9   : > { %v447_v24 = vadd.f32 %v908_v18, %v446_v21  ;;  %v466_v25 = vpop.f32.mrb[1].mxu1  ;;  %v472_v30 = vadd.f32 %v987_v22, %v908_v18 }
  0xea   : > { %v486_v26 = vmax.f32 %v452_v20, 0.0  ;;  %v467_v27 = vadd.f32 %v908_v18, %v466_v25 }
  0xeb   : > { %v485_v28 = vmax.f32 %v447_v24, 0.0  ;;  %v984_v29 = vpop.f32.mrb[2].mxu0  ;;  %v490_v44 = vmax.f32 %v472_v30, 0.0 }
  0xec   : > { %v499_v31 = vmul.f32 %v917_v23, %v486_v26  ;;  %v462_v33 = vadd.f32 %v984_v29, %v908_v18  ;;  %v456_v34 = vpop.f32.mrb[3].mxu0  ;;  %v489_v35 = vmax.f32 %v467_v27, 0.0  ;;  %v990_v36 = vpop.f32.mrb[2].mxu1 }
  0xed   : > { %v498_v37 = vmul.f32 %v917_v23, %v485_v28  ;;  %v457_v38 = vadd.f32 %v908_v18, %v456_v34  ;;  %v476_v39 = vpop.f32.mrb[3].mxu1  ;;  %v482_v48 = vadd.f32 %v990_v36, %v908_v18  ;;  %v503_v55 = vmul.f32 %v917_v23, %v490_v44 }
  0xee   : > { %v488_v40 = vmax.f32 %v462_v33, 0.0  ;;  %v477_v41 = vadd.f32 %v908_v18, %v476_v39  ;;  %v502_v45 = vmul.f32 %v917_v23, %v489_v35  ;;  %v512_v46 = vadd.f32 %v918_v32, %v499_v31 }
  0xef   : > { %v511_v42 = vadd.f32 %v918_v32, %v498_v37  ;;  %v487_v43 = vmax.f32 %v457_v38, 0.0  ;;  %v492_v56 = vmax.f32 %v482_v48, 0.0  ;;  %v516_v58 = vadd.f32 %v918_v32, %v503_v55 }
  0xf0   : > { %v501_v47 = vmul.f32 %v917_v23, %v488_v40  ;;  %v491_v49 = vmax.f32 %v477_v41, 0.0  ;;  %v515_v52 = vadd.f32 %v918_v32, %v502_v45 }
  0xf1   : > { %v500_v50 = vmul.f32 %v917_v23, %v487_v43  ;;  %999 = vmatprep.mubr.msk.f32.mxu1 %vm530_vm1, %v511_v42  ;;  %v505_v59 = vmul.f32 %v917_v23, %v492_v56 }
  0xf2   : > { %1000 = vmatmul.mubr.msk.f32.vlgmr.msra.gmra.mrb[4].mxu1 %vm530_vm1, %v512_v46  ;;  %v504_v53 = vmul.f32 %v917_v23, %v491_v49  ;;  %v514_v54 = vadd.f32 %v918_v32, %v501_v47  ;;  %v930_v46 = vld [vmem:[#allocation2] ss:$0 sm:$0xff] }
  0xf3   : > { %v513_v51 = vadd.f32 %v918_v32, %v500_v50  ;;  %v518_v60 = vadd.f32 %v918_v32, %v505_v59 }
  0xf4   : > { %v517_v57 = vadd.f32 %v918_v32, %v504_v53 }
  0xf5   : > { %1002 = vmatprep.mubr.msk.f32.mxu1 %vm530_vm1, %v513_v51 }
  0xf6   : > { %1003 = vmatmul.mubr.msk.f32.gmra.mrb[6].mxu1 %vm530_vm1, %v514_v54 }
  0xf7   : > { %1005 = vmatprep.mubr.msk.f32.mxu1 %vm530_vm1, %v515_v52 }
  0xfa   : > { %1006 = vmatmul.mubr.msk.f32.gmra.mrb[8].mxu1 %vm530_vm1, %v516_v58 }
  0xfb   : > { %1008 = vmatprep.mubr.msk.f32.mxu1 %vm530_vm1, %v517_v57 }
  0xfe   : > { %1009 = vmatmul.mubr.msk.f32.gmra.mrb[10].mxu1 %vm530_vm1, %v518_v60 }
 0x1c5   : > { %v1001_v4 = vpop.f32.mrb[4].mxu1 }
 0x1c6   : > { %v627_v5 = vadd.f32 %v1001_v4, %v919_v3  ;;  %v621_v6 = vpop.f32.mrb[5].mxu1 }
 0x1c7   : > { %v622_v8 = vadd.f32 %v919_v3, %v621_v6 }
 0x1c8   : > { %v661_v9 = vmax.f32 %v627_v5, 0.0 }
 0x1c9   : > { %v660_v10 = vmax.f32 %v622_v8, 0.0  ;;  %v1004_v11 = vpop.f32.mrb[6].mxu1 }
 0x1ca   : > { %v674_v12 = vmul.f32 %v928_v7, %v661_v9  ;;  %v637_v14 = vadd.f32 %v1004_v11, %v919_v3  ;;  %v631_v15 = vpop.f32.mrb[7].mxu1 }
 0x1cb   : > { %v673_v16 = vmul.f32 %v928_v7, %v660_v10  ;;  %v632_v17 = vadd.f32 %v919_v3, %v631_v15 }
 0x1cc   : > { %v663_v18 = vmax.f32 %v637_v14, 0.0  ;;  %v687_v22 = vadd.f32 %v929_v13, %v674_v12 }
 0x1cd   : > { %v686_v19 = vadd.f32 %v929_v13, %v673_v16  ;;  %v662_v20 = vmax.f32 %v632_v17, 0.0  ;;  %v1007_v21 = vpop.f32.mrb[8].mxu1 }
 0x1ce   : > { %v676_v23 = vmul.f32 %v928_v7, %v663_v18  ;;  %v647_v24 = vadd.f32 %v1007_v21, %v919_v3  ;;  %v641_v25 = vpop.f32.mrb[9].mxu1 }
 0x1cf   : > { %v675_v26 = vmul.f32 %v928_v7, %v662_v20  ;;  %v642_v27 = vadd.f32 %v919_v3, %v641_v25  ;;  %1019 = vmatprep.mubr.msk.f32.mxu0 %vm530_vm1, %v686_v19 }
 0x1d0   : > { %v665_v28 = vmax.f32 %v647_v24, 0.0  ;;  %1020 = vmatmul.mubr.msk.f32.vlgmr.msra.gmra.mrb[4].mxu0 %vm530_vm1, %v687_v22  ;;  %v689_v32 = vadd.f32 %v929_v13, %v676_v23 }
 0x1d1   : > { %v688_v29 = vadd.f32 %v929_v13, %v675_v26  ;;  %v664_v30 = vmax.f32 %v642_v27, 0.0  ;;  %v1010_v31 = vpop.f32.mrb[10].mxu1 }
 0x1d2   : > { %v678_v33 = vmul.f32 %v928_v7, %v665_v28  ;;  %v657_v34 = vadd.f32 %v1010_v31, %v919_v3  ;;  %v651_v35 = vpop.f32.mrb[11].mxu1 }
 0x1d3   : > { %v677_v36 = vmul.f32 %v928_v7, %v664_v30  ;;  %v652_v37 = vadd.f32 %v919_v3, %v651_v35  ;;  %1022 = vmatprep.mubr.msk.f32.mxu0 %vm530_vm1, %v688_v29 }
 0x1d4   : > { %v667_v38 = vmax.f32 %v657_v34, 0.0  ;;  %1023 = vmatmul.mubr.msk.f32.gmra.mrb[6].mxu0 %vm530_vm1, %v689_v32  ;;  %v691_v41 = vadd.f32 %v929_v13, %v678_v33 }
 0x1d5   : > { %v690_v39 = vadd.f32 %v929_v13, %v677_v36  ;;  %v666_v40 = vmax.f32 %v652_v37, 0.0 }
 0x1d6   : > { %v680_v42 = vmul.f32 %v928_v7, %v667_v38 }
 0x1d7   : > { %v679_v43 = vmul.f32 %v928_v7, %v666_v40  ;;  %1025 = vmatprep.mubr.msk.f32.mxu0 %vm530_vm1, %v690_v39 }
 0x1d8   : > { %1026 = vmatmul.mubr.msk.f32.gmra.mrb[8].mxu0 %vm530_vm1, %v691_v41  ;;  %v693_v45 = vadd.f32 %v929_v13, %v680_v42 }
 0x1d9   : > { %v692_v44 = vadd.f32 %v929_v13, %v679_v43 }
 0x1db   : > { %1028 = vmatprep.mubr.msk.f32.mxu0 %vm530_vm1, %v692_v44 }
 0x1dc   : > { %1029 = vmatmul.mubr.msk.f32.gmra.mrb[10].mxu0 %vm530_vm1, %v693_v45 }
 0x2a3   : > { %v1021_v47 = vpop.f32.mrb[4].mxu0 }
 0x2a4   : > { %v801_v48 = vadd.f32 %v1021_v47, %v930_v46  ;;  %v795_v49 = vpop.f32.mrb[5].mxu0 }
 0x2a5   : > { %v796_v50 = vadd.f32 %v930_v46, %v795_v49 }
 0x2a6   : > { %836 = vst.msk [vmem:[%s336_s12 + $0x8] sm:$0xff] %vm834_vm2, %v801_v48 }
 0x2a7   : > { %835 = vst.msk [vmem:[%s336_s12] sm:$0xff] %vm834_vm2, %v796_v50  ;;  %v1024_v51 = vpop.f32.mrb[6].mxu0 }
 0x2a8   : > { %v811_v52 = vadd.f32 %v1024_v51, %v930_v46  ;;  %v805_v53 = vpop.f32.mrb[7].mxu0 }
 0x2a9   : > { %v806_v54 = vadd.f32 %v930_v46, %v805_v53 }
 0x2aa   : > { %838 = vst.msk [vmem:[%s336_s12 + $0x18] sm:$0xff] %vm834_vm2, %v811_v52 }
 0x2ab   : > { %837 = vst.msk [vmem:[%s336_s12 + $0x10] sm:$0xff] %vm834_vm2, %v806_v54  ;;  %v1027_v55 = vpop.f32.mrb[8].mxu0 }
 0x2ac   : > { %v821_v56 = vadd.f32 %v1027_v55, %v930_v46  ;;  %v815_v57 = vpop.f32.mrb[9].mxu0 }
 0x2ad   : > { %v816_v58 = vadd.f32 %v930_v46, %v815_v57 }
 0x2ae   : > { %840 = vst.msk [vmem:[%s336_s12 + $0x28] sm:$0xff] %vm834_vm2, %v821_v56 }
 0x2af   : > { %839 = vst.msk [vmem:[%s336_s12 + $0x20] sm:$0xff] %vm834_vm2, %v816_v58  ;;  %v1030_v59 = vpop.f32.mrb[10].mxu0 }
 0x2b0   : > { %v831_v60 = vadd.f32 %v1030_v59, %v930_v46  ;;  %v825_v61 = vpop.f32.mrb[11].mxu0 }
 0x2b1   : > { %v826_v62 = vadd.f32 %v930_v46, %v825_v61 }
 0x2b2   : > { %842 = vst.msk [vmem:[%s336_s12 + $0x38] sm:$0xff] %vm834_vm2, %v831_v60 }
 0x2b3   : > { %841 = vst.msk [vmem:[%s336_s12 + $0x30] sm:$0xff] %vm834_vm2, %v826_v62 }
 0x2b4 PF: > { %s21_s11 = sadd.s32 1, %s1067_s11  }
 0x2b5   : > { %p18_p4 = scmp.ge.s32.totalorder %s21_s11, 6  }
 0x2b7   :  { %20 = sbr.rel (!%p18_p4) target bundleno = 3 (0x3), region = 86 }

</bundles_post_ra>
